<compile_context>
chip_gen: v5e
topology: v5e:2x2
jax: 0.10.0
libtpu: 0.0.40
codegen_flags: <defaults>
</compile_context>

<pallas_src>
import functools

import jax
import jax.numpy as jnp
from jax.experimental import pallas as pl
from jax.experimental.pallas import tpu as pltpu


# ----------------------------------------------------------------------------
# Tiled fused linear:  y = x @ w + b   (bf16 MXU operands, f32 accumulation)
# ----------------------------------------------------------------------------
def _pick_tile(dim, cap, align):
    """Largest `align`-multiple tile <= cap that divides dim; else whole dim."""
    if dim <= cap:
        return dim
    t = (cap // align) * align
    while t >= align:
        if dim % t == 0:
            return t
        t -= align
    return dim


def _linear_kernel(x_ref, w_ref, b_ref, o_ref, acc_ref, *, activation):
    k = pl.program_id(2)

    @pl.when(k == 0)
    def _():
        acc_ref[...] = jnp.zeros_like(acc_ref)

    acc_ref[...] += jnp.dot(
        x_ref[...].astype(jnp.bfloat16),
        w_ref[...].astype(jnp.bfloat16),
        preferred_element_type=jnp.float32)

    @pl.when(k == pl.num_programs(2) - 1)
    def _():
        y = acc_ref[...] + b_ref[...].astype(jnp.float32)
        if activation == "tanh":
            y = jnp.tanh(y)
        o_ref[...] = y.astype(o_ref.dtype)


def pallas_linear(x, w, b, activation="none"):
    """x: [M, K] f32, w: [K, N] f32, b: [N] f32 -> [M, N] f32."""
    M, K = x.shape
    _, N = w.shape
    tm = _pick_tile(M, 256, 8)
    tn = _pick_tile(N, 256, 128)
    tk = _pick_tile(K, 512, 128)
    grid = (M // tm, N // tn, K // tk)
    return pl.pallas_call(
        functools.partial(_linear_kernel, activation=activation),
        grid=grid,
        in_specs=[
            pl.BlockSpec((tm, tk), lambda i, j, k: (i, k)),
            pl.BlockSpec((tk, tn), lambda i, j, k: (k, j)),
            pl.BlockSpec((1, tn), lambda i, j, k: (0, j)),
        ],
        out_specs=pl.BlockSpec((tm, tn), lambda i, j, k: (i, j)),
        out_shape=jax.ShapeDtypeStruct((M, N), jnp.float32),
        scratch_shapes=[pltpu.VMEM((tm, tn), jnp.float32)],
        compiler_params=pltpu.CompilerParams(
            dimension_semantics=("parallel", "parallel", "arbitrary"),
            vmem_limit_bytes=32 * 1024 * 1024),
    )(x, w, b.reshape(1, N))


# ----------------------------------------------------------------------------
# Bidirectional LSTM recurrence (input projections already hoisted out).
#   gates_* : [S, B, 4*Dh]  = x @ W_ih^T + b_ih + b_hh   (per direction)
#   mask    : [S, B, 1]     float (1 = valid, 0 = pad)
#   w_hh_*  : [Dh, 4*Dh]    (transposed recurrent weights)
# Outputs: out_f, out_b : [S, B, Dh]  (zero at padded positions).
# ----------------------------------------------------------------------------
def _bilstm_kernel(gf_ref, gb_ref, mf_ref, mb_ref, whh_f_ref, whh_b_ref,
                   of_ref, ob_ref, hf, cf, hb, cb):
    t = pl.program_id(0)

    @pl.when(t == 0)
    def _():
        hf[...] = jnp.zeros_like(hf)
        cf[...] = jnp.zeros_like(cf)
        hb[...] = jnp.zeros_like(hb)
        cb[...] = jnp.zeros_like(cb)

    Dh = hf.shape[1]

    def cell(z, h_prev, c_prev, whh):
        # PyTorch gate order: i, f, g, o
        z = z + jnp.dot(h_prev, whh, preferred_element_type=jnp.float32)
        i = jax.nn.sigmoid(z[:, 0:Dh])
        f = jax.nn.sigmoid(z[:, Dh:2 * Dh])
        g = jnp.tanh(z[:, 2 * Dh:3 * Dh])
        o = jax.nn.sigmoid(z[:, 3 * Dh:4 * Dh])
        c = f * c_prev + i * g
        h = o * jnp.tanh(c)
        return h, c

    # ---- forward direction: time index t ----
    mf = mf_ref[0]                                        # [B, 1]
    h_new, c_new = cell(gf_ref[0], hf[...], cf[...], whh_f_ref[...])
    hf[...] = mf * h_new + (1.0 - mf) * hf[...]
    cf[...] = mf * c_new + (1.0 - mf) * cf[...]
    of_ref[0] = (hf[...] * mf).astype(of_ref.dtype)       # padded rows -> 0

    # ---- backward direction: time index S-1-t ----
    mb = mb_ref[0]
    h_new, c_new = cell(gb_ref[0], hb[...], cb[...], whh_b_ref[...])
    hb[...] = mb * h_new + (1.0 - mb) * hb[...]           # state stays 0 until
    cb[...] = mb * c_new + (1.0 - mb) * cb[...]           # the sequence starts
    ob_ref[0] = (hb[...] * mb).astype(ob_ref.dtype)


def pallas_bilstm(gates_f, gates_b, mask_tb, w_hh_f, w_hh_b):
    S, B, G = gates_f.shape
    Dh = G // 4
    t_fwd = lambda t: (t, 0, 0)
    t_bwd = lambda t: (S - 1 - t, 0, 0)
    const2 = lambda t: (0, 0)
    return pl.pallas_call(
        _bilstm_kernel,
        grid=(S,),
        in_specs=[
            pl.BlockSpec((1, B, G), t_fwd),
            pl.BlockSpec((1, B, G), t_bwd),
            pl.BlockSpec((1, B, 1), t_fwd),
            pl.BlockSpec((1, B, 1), t_bwd),
            pl.BlockSpec((Dh, G), const2),     # DMA'd once (constant index)
            pl.BlockSpec((Dh, G), const2),
        ],
        out_specs=[
            pl.BlockSpec((1, B, Dh), t_fwd),
            pl.BlockSpec((1, B, Dh), t_bwd),
        ],
        out_shape=[
            jax.ShapeDtypeStruct((S, B, Dh), jnp.float32),
            jax.ShapeDtypeStruct((S, B, Dh), jnp.float32),
        ],
        scratch_shapes=[
            pltpu.VMEM((B, Dh), jnp.float32),   # h_fwd
            pltpu.VMEM((B, Dh), jnp.float32),   # c_fwd
            pltpu.VMEM((B, Dh), jnp.float32),   # h_bwd
            pltpu.VMEM((B, Dh), jnp.float32),   # c_bwd
        ],
        compiler_params=pltpu.CompilerParams(
            dimension_semantics=("arbitrary",)),   # recurrence is sequential
    )(gates_f, gates_b, mask_tb, mask_tb, w_hh_f, w_hh_b)


# ----------------------------------------------------------------------------
# Fused attention pooling (per batch element):
#   act    = tanh(outputs @ Wa^T + ba)           (dropout = identity, eval)
#   scores = sum_h act * context
#   w      = softmax(where(mask, scores, -1e-32))   over S (matches masked_fill)
#   hidden = sum_s outputs * w
# ----------------------------------------------------------------------------
def _attn_pool_kernel(x_ref, wa_ref, ba_ref, ctx_ref, m_ref, hid_ref):
    x = x_ref[0]                                           # [S, H] f32
    act = jnp.dot(x.astype(jnp.bfloat16),
                  wa_ref[...].astype(jnp.bfloat16),
                  preferred_element_type=jnp.float32)
    act = jnp.tanh(act + ba_ref[...].astype(jnp.float32))  # [S, H]
    ctx = ctx_ref[0]                                       # [1, H]
    scores = jnp.sum(act * ctx, axis=-1, keepdims=True)    # [S, 1]
    m = m_ref[0]                                           # [S, 1]
    # masked_fill(~mask, -1e-32): NOT -inf — padded entries still get ~exp(-max)
    scores = jnp.where(m > 0.5, scores, jnp.float32(-1e-32))
    s_max = jnp.max(scores, axis=0, keepdims=True)
    p = jnp.exp(scores - s_max)
    denom = jnp.sum(p, axis=0, keepdims=True)
    w = p * pl.reciprocal(denom, approx=True)              # EUP slot
    hid_ref[0] = jnp.sum(x * w, axis=0, keepdims=True).astype(hid_ref.dtype)


def pallas_attn_pool(outputs, wa_t, ba, context, mask_f):
    B, S, H = outputs.shape
    hidden = pl.pallas_call(
        _attn_pool_kernel,
        grid=(B,),
        in_specs=[
            pl.BlockSpec((1, S, H), lambda b: (b, 0, 0)),
            pl.BlockSpec((H, H), lambda b: (0, 0)),
            pl.BlockSpec((1, H), lambda b: (0, 0)),
            pl.BlockSpec((1, 1, H), lambda b: (b, 0, 0)),
            pl.BlockSpec((1, S, 1), lambda b: (b, 0, 0)),
        ],
        out_specs=pl.BlockSpec((1, 1, H), lambda b: (b, 0, 0)),
        out_shape=jax.ShapeDtypeStruct((B, 1, H), jnp.float32),
        compiler_params=pltpu.CompilerParams(
            dimension_semantics=("parallel",)),
    )(outputs, wa_t, ba.reshape(1, H), context[:, None, :], mask_f[:, :, None])
    return hidden[:, 0, :]


# ----------------------------------------------------------------------------
# Parameters (deterministic, PyTorch-style init; kernel-friendly layouts)
# ----------------------------------------------------------------------------
def init_params(key, hidden_size):
    H = hidden_size
    Dh = H // 2
    ks = jax.random.split(key, 11)

    def u(k, shape, scale):
        return jax.random.uniform(k, shape, jnp.float32, -scale, scale)

    s = 1.0 / (Dh ** 0.5)          # nn.LSTM default init range
    w_ih_f = u(ks[0], (4 * Dh, H), s)
    w_hh_f = u(ks[1], (4 * Dh, Dh), s)
    b_ih_f = u(ks[2], (4 * Dh,), s)
    b_hh_f = u(ks[3], (4 * Dh,), s)
    w_ih_b = u(ks[4], (4 * Dh, H), s)
    w_hh_b = u(ks[5], (4 * Dh, Dh), s)
    b_ih_b = u(ks[6], (4 * Dh,), s)
    b_hh_b = u(ks[7], (4 * Dh,), s)
    sa = 1.0 / (H ** 0.5)          # nn.Linear default init range
    wa = u(ks[8], (H, H), sa)
    ba = u(ks[9], (H,), sa)
    context = jax.random.uniform(ks[10], (H,), jnp.float32)   # torch.rand

    return {
        # both directions' input projections fused into one [H, 4H] matmul
        "w_ih_cat": jnp.concatenate([w_ih_f.T, w_ih_b.T], axis=1),
        "b_cat": jnp.concatenate([b_ih_f + b_hh_f, b_ih_b + b_hh_b]),
        "w_hh_f": w_hh_f.T,        # [Dh, 4Dh]
        "w_hh_b": w_hh_b.T,        # [Dh, 4Dh]
        "wa_t": wa.T,              # [H, H]   (x @ Wa^T)
        "ba": ba,
        "context": context,
    }


# ----------------------------------------------------------------------------
# Forward pass == LstmAttn.forward (dropout = identity / eval mode)
# ----------------------------------------------------------------------------
def lstm_attn_forward(params, inputs, attention_mask=None,
                      dynamic_context=None, use_rnn=True):
    B, S, H = inputs.shape
    Dh = H // 2
    if attention_mask is None:
        attention_mask = jnp.ones((B, S), jnp.bool_)
    mask_f = attention_mask.astype(jnp.float32)

    if use_rnn:
        # Hoisted input projection for both LSTM directions: one fused matmul.
        x_tb = jnp.transpose(inputs, (1, 0, 2)).reshape(S * B, H)      # [S*B, H]
        gates = pallas_linear(x_tb, params["w_ih_cat"], params["b_cat"])
        gates = gates.reshape(S, B, 8 * Dh)
        gates_f = gates[:, :, : 4 * Dh]                                # [S,B,4Dh]
        gates_b = gates[:, :, 4 * Dh:]
        mask_tb = jnp.transpose(mask_f, (1, 0))[:, :, None]            # [S,B,1]

        out_f, out_b = pallas_bilstm(gates_f, gates_b, mask_tb,
                                     params["w_hh_f"], params["w_hh_b"])
        outputs = jnp.transpose(jnp.concatenate([out_f, out_b], axis=-1),
                                (1, 0, 2))                             # [B,S,H]
    else:
        outputs = inputs

    if dynamic_context is None:
        context = jnp.broadcast_to(params["context"][None, :], (B, H))
    else:
        context = dynamic_context

    hidden = pallas_attn_pool(outputs, params["wa_t"], params["ba"],
                              context, mask_f)
    return outputs, hidden


# ----------------------------------------------------------------------------
if __name__ == "__main__":
    B, S, H = 2, 8, 32

    key = jax.random.PRNGKey(0)
    kp, kx = jax.random.split(key)
    params = init_params(kp, H)
    inputs = jax.random.normal(kx, (B, S, H), jnp.float32)
    attention_mask = jnp.array([[1, 1, 1, 1, 1, 1, 1, 1],
                                [1, 1, 1, 1, 1, 1, 0, 0]], dtype=jnp.bool_)

    fwd = jax.jit(functools.partial(lstm_attn_forward, use_rnn=True))
    outputs, hidden = fwd(params, inputs, attention_mask)
    jax.block_until_ready((outputs, hidden))

    assert outputs.shape == (B, S, H)
    assert hidden.shape == (B, H)
    assert bool(jnp.all(jnp.isfinite(outputs)))
    assert bool(jnp.all(jnp.isfinite(hidden)))
    # padded positions must be zero, matching pad_packed_sequence
    assert bool(jnp.all(outputs[1, 6:, :] == 0.0))
    print("KERNEL_OK")
</pallas_src>

<mosaic_0001>
module attributes {stable_mosaic.version = 11 : i64} {
  func.func @_attn_pool_kernel(%arg0: i32, %arg1: memref<1x8x32xf32, #tpu.memory_space<vmem>>, %arg2: memref<32x32xf32, #tpu.memory_space<vmem>>, %arg3: memref<1x32xf32, #tpu.memory_space<vmem>>, %arg4: memref<1x1x32xf32, #tpu.memory_space<vmem>>, %arg5: memref<1x8x1xf32, #tpu.memory_space<vmem>>, %arg6: memref<1x1x32xf32, #tpu.memory_space<vmem>>) attributes {dimension_semantics = [#tpu.dimension_semantics<parallel>], iteration_bounds = array<i64: 2>, scalar_prefetch = 0 : i64, scratch_operands = 0 : i64, tpu.core_type = #tpu.core_type<tc>, window_params = [{transform_indices = @transform_0, window_bounds = array<i64: 1, 8, 32>}, {pipeline_mode = #tpu.pipeline_mode<synchronous>, transform_indices = @transform_1, window_bounds = array<i64: 32, 32>}, {pipeline_mode = #tpu.pipeline_mode<synchronous>, transform_indices = @transform_2, window_bounds = array<i64: 1, 32>}, {transform_indices = @transform_3, window_bounds = array<i64: 1, 1, 32>}, {transform_indices = @transform_4, window_bounds = array<i64: 1, 8, 1>}, {transform_indices = @transform_5, window_bounds = array<i64: 1, 1, 32>}]} {
    %c0 = arith.constant 0 : index
    %c0_0 = arith.constant 0 : index
    %c0_1 = arith.constant 0 : index
    %0 = vector.load %arg1[%c0, %c0_0, %c0_1] : memref<1x8x32xf32, #tpu.memory_space<vmem>>, vector<1x8x32xf32>
    %1 = vector.shape_cast %0 : vector<1x8x32xf32> to vector<8x32xf32>
    %2 = arith.truncf %1 : vector<8x32xf32> to vector<8x32xbf16>
    %c0_2 = arith.constant 0 : index
    %c0_3 = arith.constant 0 : index
    %3 = vector.load %arg2[%c0_2, %c0_3] : memref<32x32xf32, #tpu.memory_space<vmem>>, vector<32x32xf32>
    %4 = arith.truncf %3 : vector<32x32xf32> to vector<32x32xbf16>
    %cst = arith.constant dense<0.000000e+00> : vector<8x32xf32>
    %5 = tpu.matmul %2, %4, %cst {dimension_numbers = #tpu.dot_dimension_numbers<[1], [0], [0], [1], [0, 0, 1, 1], [], []>} : vector<8x32xbf16>, vector<32x32xbf16>, vector<8x32xf32> -> vector<8x32xf32>
    %c0_4 = arith.constant 0 : index
    %c0_5 = arith.constant 0 : index
    %6 = vector.load %arg3[%c0_4, %c0_5] : memref<1x32xf32, #tpu.memory_space<vmem>>, vector<1x32xf32>
    %7 = vector.broadcast %6 : vector<1x32xf32> to vector<8x32xf32>
    %8 = arith.addf %5, %7 : vector<8x32xf32>
    %9 = math.tanh %8 : vector<8x32xf32>
    %c0_6 = arith.constant 0 : index
    %c0_7 = arith.constant 0 : index
    %c0_8 = arith.constant 0 : index
    %10 = vector.load %arg4[%c0_6, %c0_7, %c0_8] : memref<1x1x32xf32, #tpu.memory_space<vmem>>, vector<1x1x32xf32>
    %11 = vector.shape_cast %10 : vector<1x1x32xf32> to vector<1x32xf32>
    %12 = vector.broadcast %11 : vector<1x32xf32> to vector<8x32xf32>
    %13 = arith.mulf %9, %12 : vector<8x32xf32>
    %cst_9 = arith.constant dense<0.000000e+00> : vector<8xf32>
    %14 = vector.multi_reduction <add>, %13, %cst_9 [1] : vector<8x32xf32> to vector<8xf32>
    %15 = vector.shape_cast %14 : vector<8xf32> to vector<8x1xf32>
    %c0_10 = arith.constant 0 : index
    %c0_11 = arith.constant 0 : index
    %c0_12 = arith.constant 0 : index
    %16 = vector.load %arg5[%c0_10, %c0_11, %c0_12] : memref<1x8x1xf32, #tpu.memory_space<vmem>>, vector<1x8x1xf32>
    %17 = vector.shape_cast %16 : vector<1x8x1xf32> to vector<8x1xf32>
    %cst_13 = arith.constant 5.000000e-01 : f32
    %18 = vector.broadcast %cst_13 : f32 to vector<8x1xf32>
    %19 = arith.cmpf ogt, %17, %18 : vector<8x1xf32>
    %cst_14 = arith.constant -1.000000e-32 : f32
    %20 = vector.broadcast %cst_14 : f32 to vector<8x1xf32>
    %21 = arith.select %19, %15, %20 : vector<8x1xi1>, vector<8x1xf32>
    %cst_15 = arith.constant dense<0xFF800000> : vector<1xf32>
    %22 = vector.multi_reduction <maximumf>, %21, %cst_15 [0] : vector<8x1xf32> to vector<1xf32>
    %23 = vector.shape_cast %22 : vector<1xf32> to vector<1x1xf32>
    %24 = vector.broadcast %23 : vector<1x1xf32> to vector<8x1xf32>
    %25 = arith.subf %21, %24 : vector<8x1xf32>
    %26 = math.exp %25 : vector<8x1xf32>
    %cst_16 = arith.constant dense<0.000000e+00> : vector<1xf32>
    %27 = vector.multi_reduction <add>, %26, %cst_16 [0] : vector<8x1xf32> to vector<1xf32>
    %28 = vector.shape_cast %27 : vector<1xf32> to vector<1x1xf32>
    %29 = tpu.reciprocal %28 {approx = true} : vector<1x1xf32> -> vector<1x1xf32>
    %30 = vector.broadcast %29 : vector<1x1xf32> to vector<8x1xf32>
    %31 = arith.mulf %26, %30 : vector<8x1xf32>
    %32 = vector.broadcast %31 : vector<8x1xf32> to vector<8x32xf32>
    %33 = arith.mulf %1, %32 : vector<8x32xf32>
    %cst_17 = arith.constant dense<0.000000e+00> : vector<32xf32>
    %34 = vector.multi_reduction <add>, %33, %cst_17 [0] : vector<8x32xf32> to vector<32xf32>
    %35 = vector.shape_cast %34 : vector<32xf32> to vector<1x32xf32>
    %c0_18 = arith.constant 0 : index
    %c0_19 = arith.constant 0 : index
    %c0_20 = arith.constant 0 : index
    %36 = vector.load %arg6[%c0_18, %c0_19, %c0_20] : memref<1x1x32xf32, #tpu.memory_space<vmem>>, vector<1x1x32xf32>
    %37 = vector.shape_cast %36 : vector<1x1x32xf32> to vector<1x32xf32>
    %38 = vector.shape_cast %35 : vector<1x32xf32> to vector<1x1x32xf32>
    tpu.vector_store %arg6[%c0_18, %c0_19, %c0_20], %38 {strides = array<i32>} : memref<1x1x32xf32, #tpu.memory_space<vmem>>, vector<1x1x32xf32>,
    return
  }
  func.func @transform_0(%arg0: i32) -> (i32, i32, i32) {
    %c0_i32 = arith.constant 0 : i32
    %c0_i32_0 = arith.constant 0 : i32
    %c0_i32_1 = arith.constant 0 : i32
    return %arg0, %c0_i32, %c0_i32_0 : i32, i32, i32
  }
  func.func @transform_1(%arg0: i32) -> (i32, i32) {
    %c0_i32 = arith.constant 0 : i32
    %c0_i32_0 = arith.constant 0 : i32
    %c0_i32_1 = arith.constant 0 : i32
    return %c0_i32, %c0_i32_0 : i32, i32
  }
  func.func @transform_2(%arg0: i32) -> (i32, i32) {
    %c0_i32 = arith.constant 0 : i32
    %c0_i32_0 = arith.constant 0 : i32
    %c0_i32_1 = arith.constant 0 : i32
    return %c0_i32, %c0_i32_0 : i32, i32
  }
  func.func @transform_3(%arg0: i32) -> (i32, i32, i32) {
    %c0_i32 = arith.constant 0 : i32
    %c0_i32_0 = arith.constant 0 : i32
    %c0_i32_1 = arith.constant 0 : i32
    return %arg0, %c0_i32, %c0_i32_0 : i32, i32, i32
  }
  func.func @transform_4(%arg0: i32) -> (i32, i32, i32) {
    %c0_i32 = arith.constant 0 : i32
    %c0_i32_0 = arith.constant 0 : i32
    %c0_i32_1 = arith.constant 0 : i32
    return %arg0, %c0_i32, %c0_i32_0 : i32, i32, i32
  }
  func.func @transform_5(%arg0: i32) -> (i32, i32, i32) {
    %c0_i32 = arith.constant 0 : i32
    %c0_i32_0 = arith.constant 0 : i32
    %c0_i32_1 = arith.constant 0 : i32
    return %arg0, %c0_i32, %c0_i32_0 : i32, i32, i32
  }
}

module attributes {stable_mosaic.version = 11 : i64} {
  func.func @_linear_kernel(%arg0: i32, %arg1: i32, %arg2: i32, %arg3: memref<16x32xf32, #tpu.memory_space<vmem>>, %arg4: memref<32x128xf32, #tpu.memory_space<vmem>>, %arg5: memref<1x128xf32, #tpu.memory_space<vmem>>, %arg6: memref<16x128xf32, #tpu.memory_space<vmem>>, %arg7: memref<16x128xf32, #tpu.memory_space<vmem>>) attributes {dimension_semantics = [#tpu.dimension_semantics<parallel>, #tpu.dimension_semantics<parallel>, #tpu.dimension_semantics<arbitrary>], iteration_bounds = array<i64: 1, 1, 1>, scalar_prefetch = 0 : i64, scratch_operands = 1 : i64, tpu.core_type = #tpu.core_type<tc>, window_params = [{transform_indices = @transform_0, window_bounds = array<i64: 16, 32>}, {transform_indices = @transform_1, window_bounds = array<i64: 32, 128>}, {transform_indices = @transform_2, window_bounds = array<i64: 1, 128>}, {transform_indices = @transform_3, window_bounds = array<i64: 16, 128>}]} {
    %c0_i32 = arith.constant 0 : i32
    %0 = arith.cmpi eq, %arg2, %c0_i32 : i32
    %1 = arith.extui %0 : i1 to i32
    %c0_i32_0 = arith.constant 0 : i32
    %2 = arith.cmpi ne, %1, %c0_i32_0 : i32
    scf.if %2 {
      %cst_10 = arith.constant 0.000000e+00 : f32
      %14 = vector.broadcast %cst_10 : f32 to vector<16x128xf32>
      %c0_11 = arith.constant 0 : index
      %c0_12 = arith.constant 0 : index
      %15 = vector.load %arg7[%c0_11, %c0_12] : memref<16x128xf32, #tpu.memory_space<vmem>>, vector<16x128xf32>
      tpu.vector_store %arg7[%c0_11, %c0_12], %14 {strides = array<i32>} : memref<16x128xf32, #tpu.memory_space<vmem>>, vector<16x128xf32>,
    } else {
    }
    %c0 = arith.constant 0 : index
    %c0_1 = arith.constant 0 : index
    %3 = vector.load %arg7[%c0, %c0_1] : memref<16x128xf32, #tpu.memory_space<vmem>>, vector<16x128xf32>
    %c0_2 = arith.constant 0 : index
    %c0_3 = arith.constant 0 : index
    %4 = vector.load %arg3[%c0_2, %c0_3] : memref<16x32xf32, #tpu.memory_space<vmem>>, vector<16x32xf32>
    %5 = arith.truncf %4 : vector<16x32xf32> to vector<16x32xbf16>
    %c0_4 = arith.constant 0 : index
    %c0_5 = arith.constant 0 : index
    %6 = vector.load %arg4[%c0_4, %c0_5] : memref<32x128xf32, #tpu.memory_space<vmem>>, vector<32x128xf32>
    %7 = arith.truncf %6 : vector<32x128xf32> to vector<32x128xbf16>
    %cst = arith.constant dense<0.000000e+00> : vector<16x128xf32>
    %8 = tpu.matmul %5, %7, %cst {dimension_numbers = #tpu.dot_dimension_numbers<[1], [0], [0], [1], [0, 0, 1, 1], [], []>} : vector<16x32xbf16>, vector<32x128xbf16>, vector<16x128xf32> -> vector<16x128xf32>
    %9 = arith.addf %3, %8 : vector<16x128xf32>
    %c0_6 = arith.constant 0 : index
    %c0_7 = arith.constant 0 : index
    %10 = vector.load %arg7[%c0_6, %c0_7] : memref<16x128xf32, #tpu.memory_space<vmem>>, vector<16x128xf32>
    tpu.vector_store %arg7[%c0_6, %c0_7], %9 {strides = array<i32>} : memref<16x128xf32, #tpu.memory_space<vmem>>, vector<16x128xf32>,
    %c0_i32_8 = arith.constant 0 : i32
    %11 = arith.cmpi eq, %arg2, %c0_i32_8 : i32
    %12 = arith.extui %11 : i1 to i32
    %c0_i32_9 = arith.constant 0 : i32
    %13 = arith.cmpi ne, %12, %c0_i32_9 : i32
    scf.if %13 {
      %c0_10 = arith.constant 0 : index
      %c0_11 = arith.constant 0 : index
      %14 = vector.load %arg7[%c0_10, %c0_11] : memref<16x128xf32, #tpu.memory_space<vmem>>, vector<16x128xf32>
      %c0_12 = arith.constant 0 : index
      %c0_13 = arith.constant 0 : index
      %15 = vector.load %arg5[%c0_12, %c0_13] : memref<1x128xf32, #tpu.memory_space<vmem>>, vector<1x128xf32>
      %16 = vector.broadcast %15 : vector<1x128xf32> to vector<16x128xf32>
      %17 = arith.addf %14, %16 : vector<16x128xf32>
      %c0_14 = arith.constant 0 : index
      %c0_15 = arith.constant 0 : index
      %18 = vector.load %arg6[%c0_14, %c0_15] : memref<16x128xf32, #tpu.memory_space<vmem>>, vector<16x128xf32>
      tpu.vector_store %arg6[%c0_14, %c0_15], %17 {strides = array<i32>} : memref<16x128xf32, #tpu.memory_space<vmem>>, vector<16x128xf32>,
    } else {
    }
    return
  }
  func.func @transform_0(%arg0: i32, %arg1: i32, %arg2: i32) -> (i32, i32) {
    %c0_i32 = arith.constant 0 : i32
    return %arg0, %arg2 : i32, i32
  }
  func.func @transform_1(%arg0: i32, %arg1: i32, %arg2: i32) -> (i32, i32) {
    %c0_i32 = arith.constant 0 : i32
    return %arg2, %arg1 : i32, i32
  }
  func.func @transform_2(%arg0: i32, %arg1: i32, %arg2: i32) -> (i32, i32) {
    %c0_i32 = arith.constant 0 : i32
    %c0_i32_0 = arith.constant 0 : i32
    return %c0_i32, %arg1 : i32, i32
  }
  func.func @transform_3(%arg0: i32, %arg1: i32, %arg2: i32) -> (i32, i32) {
    %c0_i32 = arith.constant 0 : i32
    return %arg0, %arg1 : i32, i32
  }
}

module attributes {stable_mosaic.version = 11 : i64} {
  func.func @_bilstm_kernel(%arg0: i32, %arg1: memref<1x2x64xf32, #tpu.memory_space<vmem>>, %arg2: memref<1x2x64xf32, #tpu.memory_space<vmem>>, %arg3: memref<1x2x1xf32, #tpu.memory_space<vmem>>, %arg4: memref<1x2x1xf32, #tpu.memory_space<vmem>>, %arg5: memref<16x64xf32, #tpu.memory_space<vmem>>, %arg6: memref<16x64xf32, #tpu.memory_space<vmem>>, %arg7: memref<1x2x16xf32, #tpu.memory_space<vmem>>, %arg8: memref<1x2x16xf32, #tpu.memory_space<vmem>>, %arg9: memref<2x16xf32, #tpu.memory_space<vmem>>, %arg10: memref<2x16xf32, #tpu.memory_space<vmem>>, %arg11: memref<2x16xf32, #tpu.memory_space<vmem>>, %arg12: memref<2x16xf32, #tpu.memory_space<vmem>>) attributes {dimension_semantics = [#tpu.dimension_semantics<arbitrary>], iteration_bounds = array<i64: 8>, scalar_prefetch = 0 : i64, scratch_operands = 4 : i64, tpu.core_type = #tpu.core_type<tc>, window_params = [{transform_indices = @transform_0, window_bounds = array<i64: 1, 2, 64>}, {transform_indices = @transform_1, window_bounds = array<i64: 1, 2, 64>}, {transform_indices = @transform_2, window_bounds = array<i64: 1, 2, 1>}, {transform_indices = @transform_3, window_bounds = array<i64: 1, 2, 1>}, {pipeline_mode = #tpu.pipeline_mode<synchronous>, transform_indices = @transform_4, window_bounds = array<i64: 16, 64>}, {pipeline_mode = #tpu.pipeline_mode<synchronous>, transform_indices = @transform_5, window_bounds = array<i64: 16, 64>}, {transform_indices = @transform_6, window_bounds = array<i64: 1, 2, 16>}, {transform_indices = @transform_7, window_bounds = array<i64: 1, 2, 16>}]} {
    %c0_i32 = arith.constant 0 : i32
    %0 = arith.cmpi eq, %arg0, %c0_i32 : i32
    %1 = arith.extui %0 : i1 to i32
    %c0_i32_0 = arith.constant 0 : i32
    %2 = arith.cmpi ne, %1, %c0_i32_0 : i32
    scf.if %2 {
      %cst_61 = arith.constant 0.000000e+00 : f32
      %119 = vector.broadcast %cst_61 : f32 to vector<2x16xf32>
      %c0_62 = arith.constant 0 : index
      %c0_63 = arith.constant 0 : index
      %120 = vector.load %arg9[%c0_62, %c0_63] : memref<2x16xf32, #tpu.memory_space<vmem>>, vector<2x16xf32>
      tpu.vector_store %arg9[%c0_62, %c0_63], %119 {strides = array<i32>} : memref<2x16xf32, #tpu.memory_space<vmem>>, vector<2x16xf32>,
      %cst_64 = arith.constant 0.000000e+00 : f32
      %121 = vector.broadcast %cst_64 : f32 to vector<2x16xf32>
      %c0_65 = arith.constant 0 : index
      %c0_66 = arith.constant 0 : index
      %122 = vector.load %arg10[%c0_65, %c0_66] : memref<2x16xf32, #tpu.memory_space<vmem>>, vector<2x16xf32>
      tpu.vector_store %arg10[%c0_65, %c0_66], %121 {strides = array<i32>} : memref<2x16xf32, #tpu.memory_space<vmem>>, vector<2x16xf32>,
      %cst_67 = arith.constant 0.000000e+00 : f32
      %123 = vector.broadcast %cst_67 : f32 to vector<2x16xf32>
      %c0_68 = arith.constant 0 : index
      %c0_69 = arith.constant 0 : index
      %124 = vector.load %arg11[%c0_68, %c0_69] : memref<2x16xf32, #tpu.memory_space<vmem>>, vector<2x16xf32>
      tpu.vector_store %arg11[%c0_68, %c0_69], %123 {strides = array<i32>} : memref<2x16xf32, #tpu.memory_space<vmem>>, vector<2x16xf32>,
      %cst_70 = arith.constant 0.000000e+00 : f32
      %125 = vector.broadcast %cst_70 : f32 to vector<2x16xf32>
      %c0_71 = arith.constant 0 : index
      %c0_72 = arith.constant 0 : index
      %126 = vector.load %arg12[%c0_71, %c0_72] : memref<2x16xf32, #tpu.memory_space<vmem>>, vector<2x16xf32>
      tpu.vector_store %arg12[%c0_71, %c0_72], %125 {strides = array<i32>} : memref<2x16xf32, #tpu.memory_space<vmem>>, vector<2x16xf32>,
    } else {
    }
    %c0 = arith.constant 0 : index
    %c0_1 = arith.constant 0 : index
    %c0_2 = arith.constant 0 : index
    %3 = vector.load %arg3[%c0, %c0_1, %c0_2] : memref<1x2x1xf32, #tpu.memory_space<vmem>>, vector<1x2x1xf32>
    %4 = vector.shape_cast %3 : vector<1x2x1xf32> to vector<2x1xf32>
    %c0_3 = arith.constant 0 : index
    %c0_4 = arith.constant 0 : index
    %c0_5 = arith.constant 0 : index
    %5 = vector.load %arg1[%c0_3, %c0_4, %c0_5] : memref<1x2x64xf32, #tpu.memory_space<vmem>>, vector<1x2x64xf32>
    %6 = vector.shape_cast %5 : vector<1x2x64xf32> to vector<2x64xf32>
    %c0_6 = arith.constant 0 : index
    %c0_7 = arith.constant 0 : index
    %7 = vector.load %arg9[%c0_6, %c0_7] : memref<2x16xf32, #tpu.memory_space<vmem>>, vector<2x16xf32>
    %c0_8 = arith.constant 0 : index
    %c0_9 = arith.constant 0 : index
    %8 = vector.load %arg10[%c0_8, %c0_9] : memref<2x16xf32, #tpu.memory_space<vmem>>, vector<2x16xf32>
    %c0_10 = arith.constant 0 : index
    %c0_11 = arith.constant 0 : index
    %9 = vector.load %arg5[%c0_10, %c0_11] : memref<16x64xf32, #tpu.memory_space<vmem>>, vector<16x64xf32>
    %cst = arith.constant dense<0.000000e+00> : vector<2x64xf32>
    %10 = tpu.matmul %7, %9, %cst {dimension_numbers = #tpu.dot_dimension_numbers<[1], [0], [0], [1], [0, 0, 1, 1], [], []>} : vector<2x16xf32>, vector<16x64xf32>, vector<2x64xf32> -> vector<2x64xf32>
    %11 = arith.addf %6, %10 : vector<2x64xf32>
    %12 = vector.extract_strided_slice %11 {offsets = [0, 0], sizes = [2, 16], strides = [1, 1]} : vector<2x64xf32> to vector<2x16xf32>
    %13 = arith.negf %12 : vector<2x16xf32>
    %14 = math.exp %13 : vector<2x16xf32>
    %cst_12 = arith.constant 1.000000e+00 : f32
    %15 = vector.broadcast %cst_12 : f32 to vector<2x16xf32>
    %16 = arith.addf %15, %14 : vector<2x16xf32>
    %17 = arith.divf %15, %16 : vector<2x16xf32>
    %18 = vector.extract_strided_slice %11 {offsets = [0, 16], sizes = [2, 16], strides = [1, 1]} : vector<2x64xf32> to vector<2x16xf32>
    %19 = arith.negf %18 : vector<2x16xf32>
    %20 = math.exp %19 : vector<2x16xf32>
    %cst_13 = arith.constant 1.000000e+00 : f32
    %21 = vector.broadcast %cst_13 : f32 to vector<2x16xf32>
    %22 = arith.addf %21, %20 : vector<2x16xf32>
    %23 = arith.divf %21, %22 : vector<2x16xf32>
    %24 = vector.extract_strided_slice %11 {offsets = [0, 32], sizes = [2, 16], strides = [1, 1]} : vector<2x64xf32> to vector<2x16xf32>
    %25 = math.tanh %24 : vector<2x16xf32>
    %26 = vector.extract_strided_slice %11 {offsets = [0, 48], sizes = [2, 16], strides = [1, 1]} : vector<2x64xf32> to vector<2x16xf32>
    %27 = arith.negf %26 : vector<2x16xf32>
    %28 = math.exp %27 : vector<2x16xf32>
    %cst_14 = arith.constant 1.000000e+00 : f32
    %29 = vector.broadcast %cst_14 : f32 to vector<2x16xf32>
    %30 = arith.addf %29, %28 : vector<2x16xf32>
    %31 = arith.divf %29, %30 : vector<2x16xf32>
    %32 = arith.mulf %23, %8 : vector<2x16xf32>
    %33 = arith.mulf %17, %25 : vector<2x16xf32>
    %34 = arith.addf %32, %33 : vector<2x16xf32>
    %35 = math.tanh %34 : vector<2x16xf32>
    %36 = arith.mulf %31, %35 : vector<2x16xf32>
    %37 = vector.broadcast %4 : vector<2x1xf32> to vector<2x16xf32>
    %38 = arith.mulf %37, %36 : vector<2x16xf32>
    %cst_15 = arith.constant 1.000000e+00 : f32
    %39 = vector.broadcast %cst_15 : f32 to vector<2x1xf32>
    %40 = arith.subf %39, %4 : vector<2x1xf32>
    %c0_16 = arith.constant 0 : index
    %c0_17 = arith.constant 0 : index
    %41 = vector.load %arg9[%c0_16, %c0_17] : memref<2x16xf32, #tpu.memory_space<vmem>>, vector<2x16xf32>
    %42 = vector.broadcast %40 : vector<2x1xf32> to vector<2x16xf32>
    %43 = arith.mulf %42, %41 : vector<2x16xf32>
    %44 = arith.addf %38, %43 : vector<2x16xf32>
    %c0_18 = arith.constant 0 : index
    %c0_19 = arith.constant 0 : index
    %45 = vector.load %arg9[%c0_18, %c0_19] : memref<2x16xf32, #tpu.memory_space<vmem>>, vector<2x16xf32>
    tpu.vector_store %arg9[%c0_18, %c0_19], %44 {strides = array<i32>} : memref<2x16xf32, #tpu.memory_space<vmem>>, vector<2x16xf32>,
    %46 = vector.broadcast %4 : vector<2x1xf32> to vector<2x16xf32>
    %47 = arith.mulf %46, %34 : vector<2x16xf32>
    %cst_20 = arith.constant 1.000000e+00 : f32
    %48 = vector.broadcast %cst_20 : f32 to vector<2x1xf32>
    %49 = arith.subf %48, %4 : vector<2x1xf32>
    %c0_21 = arith.constant 0 : index
    %c0_22 = arith.constant 0 : index
    %50 = vector.load %arg10[%c0_21, %c0_22] : memref<2x16xf32, #tpu.memory_space<vmem>>, vector<2x16xf32>
    %51 = vector.broadcast %49 : vector<2x1xf32> to vector<2x16xf32>
    %52 = arith.mulf %51, %50 : vector<2x16xf32>
    %53 = arith.addf %47, %52 : vector<2x16xf32>
    %c0_23 = arith.constant 0 : index
    %c0_24 = arith.constant 0 : index
    %54 = vector.load %arg10[%c0_23, %c0_24] : memref<2x16xf32, #tpu.memory_space<vmem>>, vector<2x16xf32>
    tpu.vector_store %arg10[%c0_23, %c0_24], %53 {strides = array<i32>} : memref<2x16xf32, #tpu.memory_space<vmem>>, vector<2x16xf32>,
    %c0_25 = arith.constant 0 : index
    %c0_26 = arith.constant 0 : index
    %55 = vector.load %arg9[%c0_25, %c0_26] : memref<2x16xf32, #tpu.memory_space<vmem>>, vector<2x16xf32>
    %56 = vector.broadcast %4 : vector<2x1xf32> to vector<2x16xf32>
    %57 = arith.mulf %55, %56 : vector<2x16xf32>
    %c0_27 = arith.constant 0 : index
    %c0_28 = arith.constant 0 : index
    %c0_29 = arith.constant 0 : index
    %58 = vector.load %arg7[%c0_27, %c0_28, %c0_29] : memref<1x2x16xf32, #tpu.memory_space<vmem>>, vector<1x2x16xf32>
    %59 = vector.shape_cast %58 : vector<1x2x16xf32> to vector<2x16xf32>
    %60 = vector.shape_cast %57 : vector<2x16xf32> to vector<1x2x16xf32>
    tpu.vector_store %arg7[%c0_27, %c0_28, %c0_29], %60 {strides = array<i32>} : memref<1x2x16xf32, #tpu.memory_space<vmem>>, vector<1x2x16xf32>,
    %c0_30 = arith.constant 0 : index
    %c0_31 = arith.constant 0 : index
    %c0_32 = arith.constant 0 : index
    %61 = vector.load %arg4[%c0_30, %c0_31, %c0_32] : memref<1x2x1xf32, #tpu.memory_space<vmem>>, vector<1x2x1xf32>
    %62 = vector.shape_cast %61 : vector<1x2x1xf32> to vector<2x1xf32>
    %c0_33 = arith.constant 0 : index
    %c0_34 = arith.constant 0 : index
    %c0_35 = arith.constant 0 : index
    %63 = vector.load %arg2[%c0_33, %c0_34, %c0_35] : memref<1x2x64xf32, #tpu.memory_space<vmem>>, vector<1x2x64xf32>
    %64 = vector.shape_cast %63 : vector<1x2x64xf32> to vector<2x64xf32>
    %c0_36 = arith.constant 0 : index
    %c0_37 = arith.constant 0 : index
    %65 = vector.load %arg11[%c0_36, %c0_37] : memref<2x16xf32, #tpu.memory_space<vmem>>, vector<2x16xf32>
    %c0_38 = arith.constant 0 : index
    %c0_39 = arith.constant 0 : index
    %66 = vector.load %arg12[%c0_38, %c0_39] : memref<2x16xf32, #tpu.memory_space<vmem>>, vector<2x16xf32>
    %c0_40 = arith.constant 0 : index
    %c0_41 = arith.constant 0 : index
    %67 = vector.load %arg6[%c0_40, %c0_41] : memref<16x64xf32, #tpu.memory_space<vmem>>, vector<16x64xf32>
    %cst_42 = arith.constant dense<0.000000e+00> : vector<2x64xf32>
    %68 = tpu.matmul %65, %67, %cst_42 {dimension_numbers = #tpu.dot_dimension_numbers<[1], [0], [0], [1], [0, 0, 1, 1], [], []>} : vector<2x16xf32>, vector<16x64xf32>, vector<2x64xf32> -> vector<2x64xf32>
    %69 = arith.addf %64, %68 : vector<2x64xf32>
    %70 = vector.extract_strided_slice %69 {offsets = [0, 0], sizes = [2, 16], strides = [1, 1]} : vector<2x64xf32> to vector<2x16xf32>
    %71 = arith.negf %70 : vector<2x16xf32>
    %72 = math.exp %71 : vector<2x16xf32>
    %cst_43 = arith.constant 1.000000e+00 : f32
    %73 = vector.broadcast %cst_43 : f32 to vector<2x16xf32>
    %74 = arith.addf %73, %72 : vector<2x16xf32>
    %75 = arith.divf %73, %74 : vector<2x16xf32>
    %76 = vector.extract_strided_slice %69 {offsets = [0, 16], sizes = [2, 16], strides = [1, 1]} : vector<2x64xf32> to vector<2x16xf32>
    %77 = arith.negf %76 : vector<2x16xf32>
    %78 = math.exp %77 : vector<2x16xf32>
    %cst_44 = arith.constant 1.000000e+00 : f32
    %79 = vector.broadcast %cst_44 : f32 to vector<2x16xf32>
    %80 = arith.addf %79, %78 : vector<2x16xf32>
    %81 = arith.divf %79, %80 : vector<2x16xf32>
    %82 = vector.extract_strided_slice %69 {offsets = [0, 32], sizes = [2, 16], strides = [1, 1]} : vector<2x64xf32> to vector<2x16xf32>
    %83 = math.tanh %82 : vector<2x16xf32>
    %84 = vector.extract_strided_slice %69 {offsets = [0, 48], sizes = [2, 16], strides = [1, 1]} : vector<2x64xf32> to vector<2x16xf32>
    %85 = arith.negf %84 : vector<2x16xf32>
    %86 = math.exp %85 : vector<2x16xf32>
    %cst_45 = arith.constant 1.000000e+00 : f32
    %87 = vector.broadcast %cst_45 : f32 to vector<2x16xf32>
    %88 = arith.addf %87, %86 : vector<2x16xf32>
    %89 = arith.divf %87, %88 : vector<2x16xf32>
    %90 = arith.mulf %81, %66 : vector<2x16xf32>
    %91 = arith.mulf %75, %83 : vector<2x16xf32>
    %92 = arith.addf %90, %91 : vector<2x16xf32>
    %93 = math.tanh %92 : vector<2x16xf32>
    %94 = arith.mulf %89, %93 : vector<2x16xf32>
    %95 = vector.broadcast %62 : vector<2x1xf32> to vector<2x16xf32>
    %96 = arith.mulf %95, %94 : vector<2x16xf32>
    %cst_46 = arith.constant 1.000000e+00 : f32
    %97 = vector.broadcast %cst_46 : f32 to vector<2x1xf32>
    %98 = arith.subf %97, %62 : vector<2x1xf32>
    %c0_47 = arith.constant 0 : index
    %c0_48 = arith.constant 0 : index
    %99 = vector.load %arg11[%c0_47, %c0_48] : memref<2x16xf32, #tpu.memory_space<vmem>>, vector<2x16xf32>
    %100 = vector.broadcast %98 : vector<2x1xf32> to vector<2x16xf32>
    %101 = arith.mulf %100, %99 : vector<2x16xf32>
    %102 = arith.addf %96, %101 : vector<2x16xf32>
    %c0_49 = arith.constant 0 : index
    %c0_50 = arith.constant 0 : index
    %103 = vector.load %arg11[%c0_49, %c0_50] : memref<2x16xf32, #tpu.memory_space<vmem>>, vector<2x16xf32>
    tpu.vector_store %arg11[%c0_49, %c0_50], %102 {strides = array<i32>} : memref<2x16xf32, #tpu.memory_space<vmem>>, vector<2x16xf32>,
    %104 = vector.broadcast %62 : vector<2x1xf32> to vector<2x16xf32>
    %105 = arith.mulf %104, %92 : vector<2x16xf32>
    %cst_51 = arith.constant 1.000000e+00 : f32
    %106 = vector.broadcast %cst_51 : f32 to vector<2x1xf32>
    %107 = arith.subf %106, %62 : vector<2x1xf32>
    %c0_52 = arith.constant 0 : index
    %c0_53 = arith.constant 0 : index
    %108 = vector.load %arg12[%c0_52, %c0_53] : memref<2x16xf32, #tpu.memory_space<vmem>>, vector<2x16xf32>
    %109 = vector.broadcast %107 : vector<2x1xf32> to vector<2x16xf32>
    %110 = arith.mulf %109, %108 : vector<2x16xf32>
    %111 = arith.addf %105, %110 : vector<2x16xf32>
    %c0_54 = arith.constant 0 : index
    %c0_55 = arith.constant 0 : index
    %112 = vector.load %arg12[%c0_54, %c0_55] : memref<2x16xf32, #tpu.memory_space<vmem>>, vector<2x16xf32>
    tpu.vector_store %arg12[%c0_54, %c0_55], %111 {strides = array<i32>} : memref<2x16xf32, #tpu.memory_space<vmem>>, vector<2x16xf32>,
    %c0_56 = arith.constant 0 : index
    %c0_57 = arith.constant 0 : index
    %113 = vector.load %arg11[%c0_56, %c0_57] : memref<2x16xf32, #tpu.memory_space<vmem>>, vector<2x16xf32>
    %114 = vector.broadcast %62 : vector<2x1xf32> to vector<2x16xf32>
    %115 = arith.mulf %113, %114 : vector<2x16xf32>
    %c0_58 = arith.constant 0 : index
    %c0_59 = arith.constant 0 : index
    %c0_60 = arith.constant 0 : index
    %116 = vector.load %arg8[%c0_58, %c0_59, %c0_60] : memref<1x2x16xf32, #tpu.memory_space<vmem>>, vector<1x2x16xf32>
    %117 = vector.shape_cast %116 : vector<1x2x16xf32> to vector<2x16xf32>
    %118 = vector.shape_cast %115 : vector<2x16xf32> to vector<1x2x16xf32>
    tpu.vector_store %arg8[%c0_58, %c0_59, %c0_60], %118 {strides = array<i32>} : memref<1x2x16xf32, #tpu.memory_space<vmem>>, vector<1x2x16xf32>,
    return
  }
  func.func @transform_0(%arg0: i32) -> (i32, i32, i32) {
    %c0_i32 = arith.constant 0 : i32
    %c0_i32_0 = arith.constant 0 : i32
    %c0_i32_1 = arith.constant 0 : i32
    return %arg0, %c0_i32, %c0_i32_0 : i32, i32, i32
  }
  func.func @transform_1(%arg0: i32) -> (i32, i32, i32) {
    %c7_i32 = arith.constant 7 : i32
    %0 = arith.subi %c7_i32, %arg0 : i32
    %c0_i32 = arith.constant 0 : i32
    %c0_i32_0 = arith.constant 0 : i32
    %c0_i32_1 = arith.constant 0 : i32
    return %0, %c0_i32, %c0_i32_0 : i32, i32, i32
  }
  func.func @transform_2(%arg0: i32) -> (i32, i32, i32) {
    %c0_i32 = arith.constant 0 : i32
    %c0_i32_0 = arith.constant 0 : i32
    %c0_i32_1 = arith.constant 0 : i32
    return %arg0, %c0_i32, %c0_i32_0 : i32, i32, i32
  }
  func.func @transform_3(%arg0: i32) -> (i32, i32, i32) {
    %c7_i32 = arith.constant 7 : i32
    %0 = arith.subi %c7_i32, %arg0 : i32
    %c0_i32 = arith.constant 0 : i32
    %c0_i32_0 = arith.constant 0 : i32
    %c0_i32_1 = arith.constant 0 : i32
    return %0, %c0_i32, %c0_i32_0 : i32, i32, i32
  }
  func.func @transform_4(%arg0: i32) -> (i32, i32) {
    %c0_i32 = arith.constant 0 : i32
    %c0_i32_0 = arith.constant 0 : i32
    %c0_i32_1 = arith.constant 0 : i32
    return %c0_i32, %c0_i32_0 : i32, i32
  }
  func.func @transform_5(%arg0: i32) -> (i32, i32) {
    %c0_i32 = arith.constant 0 : i32
    %c0_i32_0 = arith.constant 0 : i32
    %c0_i32_1 = arith.constant 0 : i32
    return %c0_i32, %c0_i32_0 : i32, i32
  }
  func.func @transform_6(%arg0: i32) -> (i32, i32, i32) {
    %c0_i32 = arith.constant 0 : i32
    %c0_i32_0 = arith.constant 0 : i32
    %c0_i32_1 = arith.constant 0 : i32
    return %arg0, %c0_i32, %c0_i32_0 : i32, i32, i32
  }
  func.func @transform_7(%arg0: i32) -> (i32, i32, i32) {
    %c7_i32 = arith.constant 7 : i32
    %0 = arith.subi %c7_i32, %arg0 : i32
    %c0_i32 = arith.constant 0 : i32
    %c0_i32_0 = arith.constant 0 : i32
    %c0_i32_1 = arith.constant 0 : i32
    return %0, %c0_i32, %c0_i32_0 : i32, i32, i32
  }
}

</mosaic_0001>

<bundles_post_ra>
// kernel: lstm_attn_forward.5
= control target key start
LH: loop header
LB: loop body
LE: loop exit
PB: predicated region body
PF: predicated region fallthrough
CT: control target
= control target key end

     0   :  { %10 = vsyncpa [#allocation3], 0  ;;  %s680_s0 = inlined_call_operand.vmem [shape: f32[2,8,32], index: 0, kind: input, shape index: {}]   ;;  %s681_s1 = inlined_call_operand.vmem [shape: f32[32,32], index: 1, kind: input, shape index: {}]   ;;  %s682_s2 = inlined_call_operand.vmem [shape: f32[1,32], index: 2, kind: input, shape index: {}]   ;;  %s683_s3 = inlined_call_operand.vmem [shape: f32[2,1,32], index: 3, kind: input, shape index: {}]   ;;  %s684_s4 = inlined_call_operand.vmem [shape: f32[2,8,1], index: 4, kind: input, shape index: {}]   ;;  %s685_s5 = inlined_call_operand.hbm [shape: f32[2,1,32], index: 5, kind: output, shape index: {}]  }
   0x1   :  { %12 = vsyncpa [#allocation3 + $0x1], 0  ;;  %s569_s18 = smov 0   ;;  %s571_s19 = smov 0  }
   0x2   :  { %s573_s20 = smov 0   ;;  %s575_s21 = smov 0  }
   0x3 LB: > { %s590_s22 = sadd.s32 4294967295, %s536_s21   ;;  %s416_s23 = sadd.s32 4294967294, %s536_s21   ;;  %s536_s21 = sphi %s575_s21, %s691_s21   ;;  %s532_s20 = sphi %s573_s20, %s690_s20   ;;  %s528_s19 = sphi %s571_s19, %s689_s19   ;;  %s524_s18 = sphi %s569_s18, %s688_s18  }
   0x4   : > { %s594_s24 = sadd.s32 1, %s536_s21   ;;  %s145_s25 = sadd.s32 1, %s532_s20 }
   0x5   : > { %s142_s26 = ssub.s32 %s536_s21, %s594_s24  ;;  %p155_p0 = scmp.ne.s32.totalorder %s532_s20, %s528_s19 }
   0x6   : > { %p143_p1 = scmp.eq.s32.totalorder %s142_s26, 0  ;;  %p156_p2 = scmp.eq.s32.totalorder %s590_s22, 1 }
   0x7   : > { %p161_p3 = scmp.ne.s32.totalorder %s528_s19, %s524_s18  ;;  %p162_p4 = scmp.eq.s32.totalorder %s416_s23, 1 }
   0x8   : > { %s605_s27 = scalar_select %p143_p1, %s532_s20, %s145_s25  }
   0x9   : > { %p607_p5 = por %p156_p2, %p155_p0  ;;  %p611_p6 = por %p162_p4, %p161_p3 }
   0xa   : > { %p419_p7 = scmp.ge.s32.totalorder %s536_s21, 1  ;;  %p206_p8 = scmp.lt.s32.totalorder %s536_s21, 3 }
   0xc   : > { %p207_p9 = pnand %p419_p7, %p206_p8 }
   0xd   : > { %p239_p10 = scmp.lt.s32.totalorder (!%p207_p9), %s590_s22, 1  ;;  %s237_s10 = sand.u32 (!%p207_p9), 1, %s528_s19  }
   0xe   : > { %210 = sbr.rel (%p207_p9) target bundleno = 463 (0x1cf), region = 40  ;;  %s494_s30 = scalar_lea.hbm (!%p207_p9), %s685_s5, 2 }
  0x13   : > { %v255_v0 = vld [vmem:[%s681_s1 + $0x10] sm:$0xff]  ;;  %v256_v1 = vld [vmem:[%s681_s1 + $0x18] sm:$0xff]  ;;  %v253_v2 = vld [vmem:[%s681_s1] sm:$0xff]  ;;  %s240_s13 = scalar_select %p239_p10, %s590_s22, 1  ;;  %vm263_vm0 = vcmask 261120   ;;  %vm292_vm2 = vcmask 7168  }
  0x14   : > { %v258_v3 = vpack.c.bf16 %v256_v1, %v255_v0  ;;  %v254_v4 = vld [vmem:[%s681_s1 + $0x8] sm:$0xff]  ;;  %v466_v8 = vld [vmem:[%s682_s2] ss:$0 sm:$0xff]  ;;  %v538_v23 = vmov 0   ;;  %vm325_vm3 = vcmask 253952  }
  0x15   : > { %v257_v5 = vpack.c.bf16 %v254_v4, %v253_v2  ;;  %s420_s14 = sshll.u32 %s240_s13, 3  ;;  %s245_s26 = scalar_lea.vmem %s683_s3, %s240_s13  ;;  %465 = vset.pattern.permute.xlu0 %v538_v23 }
  0x16   : > { %273 = vmatpush.bf16.msra.mxu0 %v258_v3  ;;  %s242_s17 = scalar_lea.vmem %s680_s0, %s420_s14  ;;  %v467_v11 = vld [vmem:[%s245_s26] ss:$0 sm:$0xff]  ;;  %s249_s9 = scalar_lea.vmem %s684_s4, %s420_s14 }
  0x17   : > { %v251_v6 = vld [vmem:[%s242_s17] sm:$0xff]  ;;  %s336_s13 = scalar_lea.hbm %s685_s5, %s590_s22  ;;  %s238_s14 = scalar_lea.vmem [#allocation2], %s237_s10 }
  0x18   : > { %v252_v7 = vpack.c.bf16 %v251_v6, %v251_v6  ;;  %v289_v16 = vld [vmem:[%s249_s9] sm:$0xff]  ;;  %s338_s15 = sshll.u32 %s238_s14, 4  ;;  %s340_s16 = sshll.u32 %s336_s13, 4  ;;  %s339_s15 = int_to_ptr.vmem [resolvable:$true] %s338_s15  ;;  %s341_s16 = int_to_ptr.hbm [resolvable:$true] %s340_s16 }
  0x19   : > { %vm290_vm1 = vcmp.gt.f32.partialorder %v289_v16, 0.5  ;;  %s328_s17 = scalar_lea.sflag [#allocation3], %s237_s10  ;;  %s488_s23 = sshra.s32 %s341_s16, 4  ;;  %s489_s23 = int_to_ptr.hbm [resolvable:$true] %s488_s23 }
  0x1a   : > { %274 = vmatpush.bf16.msra.mxu0 %v257_v5  ;;  %s490_s25 = scalar_lea.hbm %s489_s23, 1  ;;  %p495_p0 = scmp.lt.s32.totalorder %s489_s23, %s685_s5 }
  0x1b   : > { %p491_p11 = scmp.ne.s32.totalorder %s489_s23, %s490_s25  ;;  %p496_p1 = scmp.lt.s32.totalorder %s494_s30, %s490_s25 }
  0x1d   : > { %422 = vmatmul.msk.bf16.vlgmr.msra.gmra.mxu0 %vm263_vm0, %v252_v7  ;;  %p492_p12 = pnand %p491_p11, %p607_p5  ;;  %p497_p2 = por %p496_p1, %p495_p0 }
  0x1f   : > { %p493_p13 = pneg %p492_p12 }
  0x21   : > { %p498_p3 = pnand %p497_p2, %p493_p13 }
  0x9a   : > { %v276_v9 = vpop.f32.mrf.mxu0 }
  0x9b   : > { %v277_v10 = vadd.f32 %v466_v8, %v276_v9 }
  0x9d   : > { %468 = vtanh.f32 %v277_v10 }
  0xa2   : > { %v278_v12 = vpop.f32.mrf.mxu0 }
  0xa3   : > { %v469_v13 = vpop.eup %468 }
  0xa4   : > { %v285_v14 = vmul.f32 %v469_v13, %v467_v11 }
  0xa6   : > { %v286_v15 = vsel %vm263_vm0, %v285_v14, 0.0 }
  0xa7   : > { %287 = vadd.xlane.f32.xlu0 %v286_v15 }
 0x11a   : > { %v288_v17 = vpop.xlane.xlu0 %287 }
 0x11b   : > { %v291_v18 = vsel %vm290_vm1, %v288_v17, -1e-32 }
 0x11c   : > { %v293_v19 = vsel %vm292_vm2, %v291_v18, -inf }
 0x11d   : > { %v294_v20 = vrot.slane %v293_v19, 4 }
 0x11f   : > { %v295_v21 = vmax.f32 %v293_v19, %v294_v20 }
 0x121   : > { %v296_v22 = vrot.slane %v295_v21, 2 }
 0x123   : > { %v297_v24 = vmax.f32 %v295_v21, %v296_v22 }
 0x125   : > { %v298_v25 = vrot.slane %v297_v24, 1 }
 0x127   : > { %v299_v26 = vmax.f32 %v297_v24, %v298_v25 }
 0x129   : > { %v300_v27 = vsub.f32 %v291_v18, %v299_v26 }
 0x12b   : > { %v301_v28 = vmul.f32 1.442695, %v300_v27 }
 0x12d   : > { %470 = vpow2.f32 %v301_v28 }
 0x133   : > { %v471_v29 = vpop.eup %470 }
 0x134   : > { %v303_v30 = vsel %vm292_vm2, %v471_v29, 0.0 }
 0x135   : > { %v304_v31 = vrot.slane %v303_v30, 4 }
 0x137   : > { %v305_v32 = vadd.f32 %v304_v31, %v303_v30 }
 0x139   : > { %v306_v33 = vrot.slane %v305_v32, 2 }
 0x13b   : > { %v307_v34 = vadd.f32 %v306_v33, %v305_v32 }
 0x13d   : > { %v308_v35 = vrot.slane %v307_v34, 1 }
 0x13f   : > { %v309_v36 = vadd.f32 %v308_v35, %v307_v34 }
 0x141   : > { %472 = vrcp.f32 %v309_v36 }
 0x147   : > { %v473_v37 = vpop.eup %472 }
 0x148   : > { %v311_v38 = vmul.f32 %v473_v37, %v471_v29 }
 0x14a   : > { %314 = vperm.xlu0 %465, %v311_v38  }
 0x1bc   : > { %v315_v39 = vpop.permute.xlu0 %314 }
 0x1bd   : > { %v317_v40 = vmul.f32 %v315_v39, %v251_v6 }
 0x1bf   : > { %v318_v41 = vsel %vm263_vm0, %v317_v40, 0.0 }
 0x1c0   : > { %v319_v42 = vrot.slane %v318_v41, 4 }
 0x1c2   : > { %v320_v43 = vadd.f32 %v319_v42, %v318_v41 }
 0x1c4   : > { %v321_v44 = vrot.slane %v320_v43, 2 }
 0x1c6   : > { %v322_v45 = vadd.f32 %v321_v44, %v320_v43 }
 0x1c8   : > { %v323_v46 = vrot.slane %v322_v45, 1 }
 0x1ca   : > { %v324_v47 = vadd.f32 %v323_v46, %v322_v45 }
 0x1cc   : > { %326 = vst.msk [vmem:[%s238_s14] sm:$0x1] %vm325_vm3, %v324_v47 }
 0x1cd   : > { %501 = shalt.err (!%p498_p3)
}
 0x1ce   : > { %425 = dma.vmem_to_hbm [thread:$0]  (%p607_p5), %s339_s15, 16, %s341_s16, %s328_s17  }
 0x1cf PF: > { %p431_p4 = scmp.ge.s32.totalorder %s536_s21, 2  ;;  %s352_s8 = sand.u32 1, %s524_s18  }
 0x1d0   : > { %s353_s9 = scalar_lea.sflag [#allocation3], %s352_s8 }
 0x1d1   : > { %p428_p7 = pnand %p431_p4, %p611_p6 }
 0x1d3   : > { %p429_p8 = pneg %p428_p7 }
 0x1d5   : > { %519 = dma.done.wait (%p429_p8), %s353_s9, 16  }
 0x1d6   : > { %521 = vsyncadd (%p429_p8), %s353_s9, 4294967280  ;;  %p15_p9 = scmp.ge.s32.totalorder %s594_s24, 4   ;;  %s688_s18 = smov %s528_s19 }
 0x1d7   : > { %s689_s19 = smov %s532_s20  ;;  %s690_s20 = smov %s605_s27 }
 0x1d8   : > { %s691_s21 = smov %s594_s24  ;;  %17 = sbr.rel (!%p15_p9) target bundleno = 3 (0x3), region = 81 }
 0x1dd   :  { %358 = vsyncpa [#allocation3], 1 }
 0x1de   :  { %360 = vsyncpa [#allocation3 + $0x1], 1 }

// kernel: lstm_attn_forward.3
= control target key start
LH: loop header
LB: loop body
LE: loop exit
PB: predicated region body
PF: predicated region fallthrough
CT: control target
= control target key end

     0   :  { %vm32_vm0 = vcmask 261120   ;;  %s120_s1 = inlined_call_operand.vmem [shape: f32[32,128], index: 1, kind: input, shape index: {}]   ;;  %s121_s0 = inlined_call_operand.vmem [shape: f32[16,32], index: 0, kind: input, shape index: {}]   ;;  %s122_s2 = inlined_call_operand.vmem [shape: f32[1,128], index: 2, kind: input, shape index: {}]   ;;  %s123_s3 = inlined_call_operand.vmem [shape: f32[16,128], index: 3, kind: output, shape index: {}]  }
   0x1   :  { %v28_v0 = vld [vmem:[%s120_s1 + $0x10] sm:$0xff]  ;;  %v29_v1 = vld [vmem:[%s120_s1 + $0x18] sm:$0xff]  ;;  %v26_v2 = vld [vmem:[%s120_s1] sm:$0xff] }
   0x2   :  { %v31_v3 = vpack.c.bf16 %v29_v1, %v28_v0  ;;  %v27_v4 = vld [vmem:[%s120_s1 + $0x8] sm:$0xff]  ;;  %v23_v6 = vld [vmem:[%s121_s0] sm:$0xff] }
   0x3   :  { %v30_v5 = vpack.c.bf16 %v27_v4, %v26_v2  ;;  %v24_v7 = vld [vmem:[%s121_s0 + $0x8] sm:$0xff]  ;;  %v72_v9 = vld [vmem:[%s122_s2] ss:$0 sm:$0xff] }
   0x4   :  { %42 = vmatpush.bf16.msra.mxu0 %v31_v3  ;;  %v25_v8 = vpack.c.bf16 %v24_v7, %v23_v6 }
   0x8   :  { %43 = vmatpush.bf16.msra.mxu0 %v30_v5 }
   0xb   :  { %71 = vmatmul.msk.bf16.vlgmr.msra.gmra.mxu0 %vm32_vm0, %v25_v8 }
  0x88   :  { %v45_v10 = vpop.f32.mrf.mxu0 }
  0x89   :  { %v63_v11 = vadd.f32 %v72_v9, %v45_v10 }
  0x8b   :  { %65 = vst [vmem:[%s123_s3] sm:$0xff] %v63_v11 }
  0x90   :  { %v47_v12 = vpop.f32.mrf.mxu0 }
  0x91   :  { %v64_v13 = vadd.f32 %v72_v9, %v47_v12 }
  0x93   :  { %66 = vst [vmem:[%s123_s3 + $0x8] sm:$0xff] %v64_v13 }

// kernel: lstm_attn_forward.4
= control target key start
LH: loop header
LB: loop body
LE: loop exit
PB: predicated region body
PF: predicated region fallthrough
CT: control target
= control target key end

     0   :  { %s818_s24 = smov 0   ;;  %s913_s0 = inlined_call_operand.vmem [shape: f32[8,2,64], index: 0, kind: input, shape index: {}]   ;;  %s914_s1 = inlined_call_operand.vmem [shape: f32[8,2,64], index: 1, kind: input, shape index: {}]   ;;  %s915_s2 = inlined_call_operand.vmem [shape: f32[8,2,1], index: 2, kind: input, shape index: {}, may-alias: {2,3}]   ;;  %s916_s3 = inlined_call_operand.vmem [shape: f32[8,2,1], index: 3, kind: input, shape index: {}, may-alias: {2,3}]   ;;  %s917_s4 = inlined_call_operand.vmem [shape: f32[16,64], index: 4, kind: input, shape index: {}]   ;;  %s918_s5 = inlined_call_operand.vmem [shape: f32[16,64], index: 5, kind: input, shape index: {}]   ;;  %s919_s6 = inlined_call_operand.vmem [shape: f32[8,2,16], index: 6, kind: output, shape index: {0}]   ;;  %s920_s7 = inlined_call_operand.vmem [shape: f32[8,2,16], index: 7, kind: output, shape index: {1}]  }
   0x1 LB: > { %s709_s25 = sadd.s32 4294967295, %s768_s24   ;;  %p713_p0 = scmp.ge.s32.totalorder %s768_s24, 1  ;;  %s768_s24 = sphi %s818_s24, %s18_s24  }
   0x2   : > { %p276_p1 = scmp.lt.s32.totalorder %s768_s24, 9 }
   0x4   : > { %p277_p2 = pnand %p713_p0, %p276_p1 }
   0x5   : > { %p325_p3 = scmp.lt.s32.totalorder (!%p277_p2), %s709_s25, 7  ;;  %s329_s26 = ssub.s32 (!%p277_p2), 7, %s709_s25 }
   0x6   : > { %280 = sbr.rel (%p277_p2) target bundleno = 633 (0x279), region = 44  ;;  %p330_p4 = scmp.lt.s32.totalorder (!%p277_p2), %s329_s26, 7 }
   0x7   : > { %p720_p5 = scmp.ne.s32.totalorder (!%p277_p2), %s709_s25, 0 }
   0xb   : > { %s326_s27 = scalar_select %p325_p3, %s709_s25, 7 }
   0xc   : > { %s922_s26 = smov (!%p330_p4, %s329_s26), 7  ;;  %358 = sbr.rel (%p720_p5) target bundleno = 22 (0x16), region = 48 }
   0xd   : > { %s826_s28 = sshll.u32 %s326_s27, 1  ;;  %s832_s9 = sshll.u32 %s922_s26, 1 }
   0xe   : > { %s328_s8 = scalar_lea.vmem %s913_s0, %s826_s28  ;;  %s333_s12 = scalar_lea.vmem %s914_s1, %s832_s9 }
   0xf   : > { %s338_s15 = scalar_lea.vmem %s915_s2, %s826_s28  ;;  %s343_s18 = scalar_lea.vmem %s916_s3, %s832_s9 }
  0x10   : > { %s348_s21 = scalar_lea.vmem %s919_s6, %s826_s28  ;;  %s353_s26 = scalar_lea.vmem %s920_s7, %s832_s9 }
  0x11   : > { %vm359_vm0 = vcmask 123904   ;;  %v770_v0 = vmov 0.0  }
  0x12   : > { %360 = vst.msk [vmem:[#allocation2] sm:$0x3] %vm359_vm0, %v770_v0 }
  0x13   : > { %361 = vst.msk [vmem:[#allocation3] sm:$0x3] %vm359_vm0, %v770_v0 }
  0x14   : > { %362 = vst.msk [vmem:[#allocation4] sm:$0x3] %vm359_vm0, %v770_v0 }
  0x15   : > { %363 = vst.msk [vmem:[#allocation5] sm:$0x3] %vm359_vm0, %v770_v0 }
  0x16 PF: > { %v369_v1 = vld [vmem:[%s917_s4 + $0x8] sm:$0xff]  ;;  %v368_v3 = vld [vmem:[%s917_s4] sm:$0xff]  ;;  %vm370_vm1 = vcmask 130048   ;;  %s771_s16 = smov 16   ;;  %v772_v9 = vmov 0   ;;  %s777_s10 = smov 80  }
  0x17   : > { %v481_v2 = vld [vmem:[%s918_s5 + $0x8] sm:$0xff]  ;;  %388 = vmatpush.msra.mxu0 %v369_v1  ;;  %v480_v4 = vld [vmem:[%s918_s5] sm:$0xff]  ;;  %743 = vset.pattern.permute.xlu0 %v772_v9  ;;  %vm458_vm10 = vcmask 123904  }
  0x18   : > { %499 = vmatpush.msra.mxu1 %v481_v2  ;;  %744 = vset.pattern.permute.xlu1 %v772_v9  ;;  %v365_v10 = vld [vmem:[%s328_s8] sm:$0x3]  ;;  %s773_s8 = smov 96  }
  0x19   : > { %v866_v5 = vld [vmem:[#allocation2] sm:$0x3]  ;;  %389 = vmatpush.msra.mxu0 %v368_v3  ;;  %745 = vset.pattern.permute.xlu2 %v772_v9 }
  0x1a   : > { %v367_v7 = vld [vmem:[#allocation3] sm:$0x3]  ;;  %500 = vmatpush.msra.mxu1 %v480_v4  ;;  %721 = vmatmul.msk.f32.vlgmr.msra.gmra.mxu0 %vm370_vm1, %v866_v5  ;;  %v476_v12 = vld [vmem:[%s343_s18] sm:$0x3]  ;;  %s776_s18 = smov 112  }
  0x1b   : > { %v868_v6 = vld [vmem:[#allocation4] sm:$0x3]  ;;  %416 = vrot.lane.b32.xlu1 %v367_v7, %s771_s16  ;;  %v553_v14 = vsub.f32 1.0, %v476_v12  ;;  %v477_v15 = vld [vmem:[%s333_s12] sm:$0x3]  ;;  %s774_s12 = smov 32  }
  0x1c   : > { %723 = vmatmul.msk.f32.vlgmr.msra.gmra.mxu1 %vm370_vm1, %v868_v6  ;;  %v479_v8 = vld [vmem:[#allocation5] sm:$0x3]  ;;  %v364_v20 = vld [vmem:[%s338_s15] sm:$0x3]  ;;  %v461_v52 = vld [vmem:[#allocation3] sm:$0x3] }
  0x1d   : > { %v442_v21 = vsub.f32 1.0, %v364_v20  ;;  %s775_s15 = smov 48   ;;  %v571_v4 = vld [vmem:[#allocation5] sm:$0x3] }
  0x23   : > { %527 = vrot.lane.b32.xlu1 %v479_v8, %s771_s16 }
  0x2b   : > { %556 = vperm.xlu1 %744, %v553_v14  }
  0x8d   : > { %v417_v55 = vpop.permute.xlu1 %416 }
  0x95   : > { %v528_v59 = vpop.permute.xlu1 %527 }
  0x97   : > { %v391_v11 = vpop.f32.mrf.mxu0 }
  0x98   : > { %v394_v13 = vadd.f32 %v391_v11, %v365_v10 }
  0x99   : > { %v502_v16 = vpop.f32.mrf.mxu1 }
  0x9a   : > { %746 = vtanh.f32 %v394_v13  ;;  %v505_v17 = vadd.f32 %v502_v16, %v477_v15  ;;  %v722_v22 = vmul.f32 -1.442695, %v394_v13 }
  0x9c   : > { %748 = vtanh.f32 %v505_v17  ;;  %v724_v23 = vmul.f32 -1.442695, %v505_v17 }
  0x9d   : > { %750 = vpow2.f32 %v722_v22  ;;  %v557_v0 = vpop.permute.xlu1 %556 }
  0x9e   : > { %752 = vpow2.f32 %v724_v23  ;;  %v559_v1 = vmul.f32 %v557_v0, %v868_v6  ;;  %v572_v7 = vmul.f32 %v571_v4, %v557_v0 }
  0xa0   : > { %v747_v18 = vpop.eup %746 }
  0xa1   : > { %421 = vrot.lane.b32.xlu0 %v747_v18, %s773_s8 }
  0xa2   : > { %v749_v19 = vpop.eup %748 }
  0xa3   : > { %v751_v24 = vpop.eup %750 }
  0xa4   : > { %v398_v25 = vadd.f32 1.0, %v751_v24  ;;  %v753_v26 = vpop.eup %752 }
  0xa5   : > { %v509_v27 = vadd.f32 1.0, %v753_v26 }
  0xa6   : > { %754 = vrcp.f32 %v398_v25  ;;  %v410_v36 = vand.u32 2147483648, %v398_v25  ;;  %vm404_vm3 = vweird.f32 %v398_v25  ;;  %v408_v37 = vand.u32 2147483647, %v398_v25 }
  0xa7   : > { %756 = vrcp.f32 %v509_v27  ;;  %vm515_vm6 = vweird.f32 %v509_v27  ;;  %v521_v45 = vand.u32 2147483648, %v509_v27  ;;  %v519_v46 = vand.u32 2147483647, %v509_v27 }
  0xa8   : > { %v411_v40 = vor.u32 1.1754944e-38, %v410_v36  ;;  %vm409_vm5 = vcmp.eq.f32.partialorder %v408_v37, 8.507059e+37 }
  0xa9   : > { %532 = vrot.lane.b32.xlu0 %v749_v19, %s773_s8  ;;  %v522_v48 = vor.u32 1.1754944e-38, %v521_v45  ;;  %vm520_vm9 = vcmp.eq.f32.partialorder %v519_v46, 8.507059e+37 }
  0xac   : > { %v755_v28 = vpop.eup %754 }
  0xad   : > { %v400_v29 = vmul.f32 %v755_v28, %v398_v25  ;;  %v757_v31 = vpop.eup %756  ;;  %vm405_vm2 = vweird.f32 %v755_v28 }
  0xae   : > { %v511_v33 = vmul.f32 %v757_v31, %v509_v27  ;;  %vm406_vm4 = vmor %vm404_vm3, %vm405_vm2  ;;  %vm516_vm7 = vweird.f32 %v757_v31 }
  0xaf   : > { %v401_v30 = vsub.f32 1.0, %v400_v29  ;;  %vm517_vm8 = vmor %vm515_vm6, %vm516_vm7 }
  0xb0   : > { %v512_v35 = vsub.f32 1.0, %v511_v33 }
  0xb1   : > { %445 = vperm.xlu0 %743, %v442_v21   ;;  %v402_v32 = vmul.f32 %v755_v28, %v401_v30 }
  0xb2   : > { %v513_v39 = vmul.f32 %v757_v31, %v512_v35 }
  0xb3   : > { %v403_v34 = vadd.f32 %v755_v28, %v402_v32 }
  0xb4   : > { %v514_v43 = vadd.f32 %v757_v31, %v513_v39 }
  0xb5   : > { %v407_v38 = vsel %vm406_vm4, %v755_v28, %v403_v34 }
  0xb6   : > { %v412_v41 = vsel %vm409_vm5, %v411_v40, %v407_v38  ;;  %v518_v47 = vsel %vm517_vm8, %v757_v31, %v514_v43 }
  0xb7   : > { %v523_v49 = vsel %vm520_vm9, %v522_v48, %v518_v47  ;;  %v419_v56 = vmul.f32 %v417_v55, %v412_v41 }
  0xb8   : > { %v530_v60 = vmul.f32 %v528_v59, %v523_v49 }
  0xb9   : > { %549 = vperm.xlu0 %743, %v476_v12  }
 0x113   : > { %v422_v42 = vpop.permute.xlu0 %421 }
 0x114   : > { %v424_v44 = vmul.f32 %v422_v42, %v412_v41 }
 0x116   : > { %426 = vrot.lane.b32.xlu2 %v424_v44, %s771_s16 }
 0x11b   : > { %v533_v50 = vpop.permute.xlu0 %532 }
 0x11c   : > { %v535_v51 = vmul.f32 %v533_v50, %v523_v49 }
 0x11e   : > { %537 = vrot.lane.b32.xlu2 %v535_v51, %s771_s16 }
 0x123   : > { %v446_v53 = vpop.permute.xlu0 %445 }
 0x124   : > { %v462_v54 = vmul.f32 %v461_v52, %v446_v53  ;;  %v448_v3 = vmul.f32 %v446_v53, %v866_v5 }
 0x126   : > { %438 = vperm.xlu2 %745, %v364_v20   ;;  %464 = vrot.lane.b32.xlu0 %v462_v54, %s771_s16 }
 0x12b   : > { %v550_v8 = vpop.permute.xlu0 %549 }
 0x170   : > { %v427_v57 = vpop.permute.xlu2 %426 }
 0x171   : > { %v429_v58 = vadd.f32 %v427_v57, %v419_v56 }
 0x173   : > { %758 = vtanh.f32 %v429_v58 }
 0x178   : > { %v538_v61 = vpop.permute.xlu2 %537 }
 0x179   : > { %v759_v62 = vpop.eup %758  ;;  %v540_v63 = vadd.f32 %v538_v61, %v530_v60 }
 0x17a   : > { %432 = vrot.lane.b32.xlu2 %v759_v62, %s774_s12 }
 0x17b   : > { %760 = vtanh.f32 %v540_v63  ;;  %v570_v21 = vmul.f32 %v550_v8, %v540_v63 }
 0x180   : > { %v439_v9 = vpop.permute.xlu2 %438 }
 0x181   : > { %v761_v2 = vpop.eup %760  ;;  %v460_v10 = vmul.f32 %v439_v9, %v429_v58 }
 0x182   : > { %543 = vrot.lane.b32.xlu1 %v761_v2, %s774_s12  ;;  %561 = vrot.lane.b32.xlu2 %v559_v1, %s775_s15 }
 0x18a   : > { %450 = vrot.lane.b32.xlu1 %v448_v3, %s775_s15 }
 0x192   : > { %574 = vrot.lane.b32.xlu1 %v572_v7, %s771_s16 }
 0x198   : > { %v465_v11 = vpop.permute.xlu0 %464 }
 0x199   : > { %v467_v12 = vadd.f32 %v465_v11, %v460_v10 }
 0x19b   : > { %469 = vrot.lane.b32.xlu1 %v467_v12, %s776_s18 }
 0x1d4   : > { %v433_v13 = vpop.permute.xlu2 %432 }
 0x1d5   : > { %v435_v16 = vmul.f32 %v433_v13, %v412_v41 }
 0x1d7   : > { %v441_v5 = vmul.f32 %v439_v9, %v435_v16 }
 0x1dc   : > { %v562_v15 = vpop.permute.xlu2 %561 }
 0x1f4   : > { %v544_v6 = vpop.permute.xlu1 %543 }
 0x1f5   : > { %v546_v14 = vmul.f32 %v544_v6, %v523_v49 }
 0x1f7   : > { %v552_v17 = vmul.f32 %v550_v8, %v546_v14 }
 0x1f9   : > { %v564_v18 = vadd.f32 %v562_v15, %v552_v17 }
 0x1fb   : > { %566 = vrot.lane.b32.xlu0 %v564_v18, %s777_s10 }
 0x1fc   : > { %v451_v19 = vpop.permute.xlu1 %450 }
 0x1fd   : > { %v453_v20 = vadd.f32 %v451_v19, %v441_v5 }
 0x1ff   : > { %455 = vrot.lane.b32.xlu2 %v453_v20, %s777_s10 }
 0x204   : > { %v575_v22 = vpop.permute.xlu1 %574 }
 0x205   : > { %v577_v23 = vadd.f32 %v575_v22, %v570_v21 }
 0x207   : > { %579 = vrot.lane.b32.xlu2 %v577_v23, %s776_s18 }
 0x20d   : > { %v470_v24 = vpop.permute.xlu1 %469 }
 0x20e   : > { %472 = vst.msk [vmem:[#allocation3] sm:$0x3] %vm458_vm10, %v470_v24 }
 0x259   : > { %v456_v25 = vpop.permute.xlu2 %455 }
 0x25a   : > { %459 = vst.msk [vmem:[#allocation2] sm:$0x3] %vm458_vm10, %v456_v25 }
 0x261   : > { %v473_v26 = vld [vmem:[#allocation2] sm:$0x3]  ;;  %v580_v27 = vpop.permute.xlu2 %579 }
 0x262   : > { %v474_v28 = vmul.f32 %v473_v26, %v439_v9  ;;  %582 = vst.msk [vmem:[#allocation5] sm:$0x3] %vm458_vm10, %v580_v27 }
 0x264   : > { %475 = vst.msk [vmem:[%s348_s21] sm:$0x3] %vm458_vm10, %v474_v28 }
 0x26d   : > { %v567_v29 = vpop.permute.xlu0 %566 }
 0x26e   : > { %569 = vst.msk [vmem:[#allocation4] sm:$0x3] %vm458_vm10, %v567_v29 }
 0x275   : > { %v583_v30 = vld [vmem:[#allocation4] sm:$0x3] }
 0x276   : > { %v584_v31 = vmul.f32 %v583_v30, %v550_v8 }
 0x278   : > { %585 = vst.msk [vmem:[%s353_s26] sm:$0x3] %vm458_vm10, %v584_v31 }
 0x279 PF: > { %s18_s24 = sadd.s32 1, %s768_s24  }
 0x27a   : > { %p15_p6 = scmp.ge.s32.totalorder %s18_s24, 10  }
 0x27c   :  { %17 = sbr.rel (!%p15_p6) target bundleno = 1 (0x1), region = 99 }

</bundles_post_ra>
